<compile_context>
chip_gen: v5e
topology: v5e:2x2
jax: 0.10.0
libtpu: 0.0.40
codegen_flags: <defaults>
</compile_context>

<pallas_src>
import functools

import jax
import jax.numpy as jnp
from jax import lax
from jax.experimental import pallas as pl
from jax.experimental.pallas import tpu as pltpu


def _round_up(x, m):
    return (x + m - 1) // m * m


def _vmem_capacity_bytes():
    """Physical VMEM per TensorCore; conservative (v7x-like) fallback."""
    try:
        info = pltpu.get_tpu_info()
        cap = getattr(info, "vmem_capacity_bytes", None)
        if cap:
            return int(cap)
    except Exception:
        pass
    return 64 * 2**20


def _conv_bn_relu_kernel(p_ref, w_ref, scale_ref, shift_ref, o_ref, acc_ref,
                         *, activation, resident_w, tk):
    # p_ref: (TM, TK) bf16
    # w_ref: (K_pad, OCp) bf16 if resident_w else (TK, OCp) bf16
    # scale/shift: (1, OCp) f32, o_ref: (TM, OCp) bf16, acc_ref: (TM, OCp) f32.
    k = pl.program_id(1)

    @pl.when(k == 0)
    def _():
        acc_ref[...] = jnp.zeros_like(acc_ref)

    if resident_w:
        start = pl.multiple_of(k * tk, tk)
        w_blk = w_ref[pl.ds(start, tk), :]
    else:
        w_blk = w_ref[...]

    acc_ref[...] += jnp.dot(p_ref[...], w_blk,
                            preferred_element_type=jnp.float32)

    @pl.when(k == pl.num_programs(1) - 1)
    def _():
        y = acc_ref[...] * scale_ref[...] + shift_ref[...]
        if activation:
            y = jnp.maximum(y, 0.0)
        o_ref[...] = y.astype(o_ref.dtype)


def _pick_tiles(m_dim, k_pad0, oc_pad, *, budget_bytes, resident_limit,
                want_two_m_tiles):
    """Pick (tm, tk, k_pad, resident_w) so the working set fits the budget."""
    # tk: multiple-of-128 <= 512 minimizing the rounded K (prefer larger tk).
    if k_pad0 <= 512:
        tk = k_pad0
    else:
        best = None
        for cand in (512, 384, 256):
            rounded = _round_up(k_pad0, cand)
            if best is None or rounded < best[0]:
                best = (rounded, cand)
        tk = best[1]
    k_pad = _round_up(k_pad0, tk)

    # Keep the whole (padded) weight matrix resident in VMEM when small.
    resident_w = k_pad * oc_pad * 2 <= resident_limit
    w_need = 2 * (k_pad if resident_w else tk) * oc_pad * 2   # conservative 2x

    m128 = max(128, _round_up(m_dim, 128))
    tm = 128
    for cand in (512, 256, 128):
        if cand > m128:
            continue
        need = (2 * cand * tk * 2        # patches block, bf16, double-buffered
                + w_need                 # weights (resident or blocked)
                + 2 * cand * oc_pad * 2  # bf16 output block, double-buffered
                + cand * oc_pad * 4)     # f32 accumulator scratch
        if need <= budget_bytes or cand == 128:
            tm = cand
            break

    # On 2-TC parts, make sure the "parallel" M axis has >= 2 tiles.
    if want_two_m_tiles:
        while tm > 128 and -(-m_dim // tm) < 2:
            tm //= 2

    return tm, tk, k_pad, resident_w


def conv_module_forward(x, w, gamma, beta, running_mean, running_var,
                        *, kernel_size, stride, bn=True, activation=True,
                        bias=None, eps=1e-5):
    """Replicates Conv.forward (NCHW input), BN in eval mode (running stats).

    x: [N, C, H, W] float32, w: [OC, C, KH, KW] float32. Returns f32 NCHW.
    """
    # TODO(synk): BatchNorm is implemented in eval mode (running stats folded
    # into an affine); PyTorch training-mode batch statistics are not replicated.
    n, c, h, w_in = x.shape
    oc, _, kh, kw = w.shape
    assert kh == kernel_size and kw == kernel_size

    # --- padding exactly as in the PyTorch forward ---
    oh_t = (h - 1) // stride * stride + kernel_size
    ow_t = (w_in - 1) // stride * stride + kernel_size
    pad_h = max(0, oh_t - h)
    pad_w = max(0, ow_t - w_in)
    pad_l, pad_r = pad_w // 2, (pad_w + 1) // 2      # F.pad(x, (l, r, t, b))
    pad_t, pad_b = pad_h // 2, (pad_h + 1) // 2

    # Cast to bf16 BEFORE padding / im2col so the KH*KW-expanded patches
    # tensor is built (written + re-read) at half the bytes.
    xb = x.astype(jnp.bfloat16)
    xp = jnp.pad(xb, ((0, 0), (0, 0), (pad_t, pad_b), (pad_l, pad_r)))

    hp, wp = xp.shape[2], xp.shape[3]
    oh = (hp - kernel_size) // stride + 1
    ow = (wp - kernel_size) // stride + 1

    # --- im2col directly in [M, K] layout (bf16 throughout) ---
    # TODO(synk): for chained Conv modules, keeping activations NHWC (and
    # fusing im2col into the kernel) would save further full HBM passes.
    xp_nhwc = jnp.transpose(xp, (0, 2, 3, 1))        # [N, Hp, Wp, C] bf16
    cols = []
    for i in range(kernel_size):
        for j in range(kernel_size):
            cols.append(xp_nhwc[:, i:i + stride * oh:stride,
                                j:j + stride * ow:stride, :])   # [N, OH, OW, C]
    patches = jnp.stack(cols, axis=-1)               # [N, OH, OW, C, KH*KW]
    m_dim = n * oh * ow
    k_dim = c * kernel_size * kernel_size
    patches = patches.reshape(m_dim, k_dim)          # bf16, K ordered (C, KH, KW)

    w_mat = w.reshape(oc, k_dim).T.astype(jnp.bfloat16)   # [K, OC]

    # --- fold BN (or bias) into a per-output-channel affine ---
    if bn:
        scale = gamma / jnp.sqrt(running_var + eps)  # [OC]
        shift = beta - running_mean * scale          # [OC]
    else:
        scale = jnp.ones((oc,), jnp.float32)
        shift = bias if bias is not None else jnp.zeros((oc,), jnp.float32)

    # --- generation-aware tiling / VMEM budgeting ---
    cap = _vmem_capacity_bytes()
    big_vmem = cap >= 100 * 2**20                    # v5e / v6e (128 MiB VMEM)
    budget = (44 if big_vmem else 18) * 2**20
    cap_limit = (64 if big_vmem else 30) * 2**20
    resident_limit = (16 if big_vmem else 8) * 2**20

    oc_pad = _round_up(oc, 128)
    k_pad0 = _round_up(k_dim, 128)
    tm, tk, k_pad, resident_w = _pick_tiles(
        m_dim, k_pad0, oc_pad, budget_bytes=budget,
        resident_limit=resident_limit, want_two_m_tiles=not big_vmem)
    m_pad = _round_up(max(m_dim, tm), tm)

    patches_p = jnp.pad(patches, ((0, m_pad - m_dim), (0, k_pad - k_dim)))
    w_p = jnp.pad(w_mat, ((0, k_pad - k_dim), (0, oc_pad - oc)))
    scale_p = jnp.pad(scale.astype(jnp.float32), (0, oc_pad - oc)).reshape(1, oc_pad)
    shift_p = jnp.pad(shift.astype(jnp.float32), (0, oc_pad - oc)).reshape(1, oc_pad)

    grid = (m_pad // tm, k_pad // tk)
    m_tiles = grid[0]

    if resident_w:
        # Whole padded weight matrix lives in VMEM; constant block index means
        # it is DMA'd from HBM only once, not once per M tile.
        w_spec = pl.BlockSpec((k_pad, oc_pad), lambda i, k: (0, 0))
        w_stream_bytes = k_pad * oc_pad * 2
        w_vmem = 2 * k_pad * oc_pad * 2
    else:
        w_spec = pl.BlockSpec((tk, oc_pad), lambda i, k: (k, 0))
        w_stream_bytes = m_tiles * k_pad * oc_pad * 2
        w_vmem = 2 * tk * oc_pad * 2

    vmem_need = (2 * tm * tk * 2            # patches block, bf16, double-buffered
                 + w_vmem                   # weights
                 + 2 * tm * oc_pad * 2      # bf16 output block, double-buffered
                 + tm * oc_pad * 4          # f32 accumulator scratch
                 + 2 * 2 * oc_pad * 4)      # scale/shift
    vmem_limit = int(min(cap_limit, max(vmem_need + 8 * 2**20, 16 * 2**20)))

    cost = pl.CostEstimate(
        flops=2 * m_dim * k_dim * oc,
        transcendentals=0,
        bytes_accessed=(m_pad * k_pad * 2       # patches read (bf16)
                        + w_stream_bytes        # weight read(s) (bf16)
                        + m_pad * oc_pad * 2    # output write (bf16)
                        + 2 * oc_pad * 4),      # scale/shift
    )

    kernel = functools.partial(_conv_bn_relu_kernel, activation=activation,
                               resident_w=resident_w, tk=tk)
    out_flat = pl.pallas_call(
        kernel,
        out_shape=jax.ShapeDtypeStruct((m_pad, oc_pad), jnp.bfloat16),
        grid_spec=pltpu.PrefetchScalarGridSpec(
            num_scalar_prefetch=0,
            grid=grid,
            in_specs=[
                pl.BlockSpec((tm, tk), lambda i, k: (i, k)),
                w_spec,
                pl.BlockSpec((1, oc_pad), lambda i, k: (0, 0)),
                pl.BlockSpec((1, oc_pad), lambda i, k: (0, 0)),
            ],
            out_specs=pl.BlockSpec((tm, oc_pad), lambda i, k: (i, 0)),
            scratch_shapes=[pltpu.VMEM((tm, oc_pad), jnp.float32)],
        ),
        compiler_params=pltpu.CompilerParams(
            dimension_semantics=("parallel", "arbitrary"),
            vmem_limit_bytes=vmem_limit),
        cost_estimate=cost,
    )(patches_p, w_p, scale_p, shift_p)

    # Slice off padding, cast back to f32 (fused into the NHWC->NCHW pass).
    out = out_flat[:m_dim, :oc].astype(jnp.float32)
    out = out.reshape(n, oh, ow, oc).transpose(0, 3, 1, 2)
    return out


def _reference(x, w, gamma, beta, mean, var, *, kernel_size, stride, eps=1e-5):
    n, c, h, w_in = x.shape
    oh_t = (h - 1) // stride * stride + kernel_size
    ow_t = (w_in - 1) // stride * stride + kernel_size
    pad_h = max(0, oh_t - h)
    pad_w = max(0, ow_t - w_in)
    xp = jnp.pad(x, ((0, 0), (0, 0),
                     (pad_h // 2, (pad_h + 1) // 2),
                     (pad_w // 2, (pad_w + 1) // 2)))
    y = lax.conv_general_dilated(
        xp, w, window_strides=(stride, stride), padding="VALID",
        dimension_numbers=("NCHW", "OIHW", "NCHW"))
    scale = (gamma / jnp.sqrt(var + eps)).reshape(1, -1, 1, 1)
    shift = (beta - mean * gamma / jnp.sqrt(var + eps)).reshape(1, -1, 1, 1)
    return jnp.maximum(y * scale + shift, 0.0)


if __name__ == "__main__":
    key = jax.random.PRNGKey(0)
    k_x, k_w, k_g, k_b, k_m, k_v = jax.random.split(key, 6)

    N, C_IN, H, W = 2, 4, 16, 16
    C_OUT, KSIZE, STRIDE = 8, 3, 2

    x = jax.random.normal(k_x, (N, C_IN, H, W), jnp.float32)
    w = jax.random.normal(k_w, (C_OUT, C_IN, KSIZE, KSIZE), jnp.float32) * 0.1
    gamma = 1.0 + 0.1 * jax.random.normal(k_g, (C_OUT,), jnp.float32)
    beta = 0.1 * jax.random.normal(k_b, (C_OUT,), jnp.float32)
    running_mean = 0.1 * jax.random.normal(k_m, (C_OUT,), jnp.float32)
    running_var = 0.5 + jnp.abs(jax.random.normal(k_v, (C_OUT,), jnp.float32))

    out = conv_module_forward(
        x, w, gamma, beta, running_mean, running_var,
        kernel_size=KSIZE, stride=STRIDE, bn=True, activation=True)
    out = jax.block_until_ready(out)

    ref = _reference(x, w, gamma, beta, running_mean, running_var,
                     kernel_size=KSIZE, stride=STRIDE)
    assert out.shape == ref.shape
    # bf16 operands + bf16 output with f32 accumulation -> relaxed tolerance.
    assert jnp.max(jnp.abs(out - ref)) < 5e-2, "mismatch vs reference conv"

    print("KERNEL_OK")
</pallas_src>

<mosaic_0001>
module attributes {stable_mosaic.version = 11 : i64} {
  func.func @_conv_bn_relu_kernel(%arg0: i32, %arg1: i32, %arg2: memref<128x128xbf16, #tpu.memory_space<vmem>>, %arg3: memref<128x128xbf16, #tpu.memory_space<vmem>>, %arg4: memref<1x128xf32, #tpu.memory_space<vmem>>, %arg5: memref<1x128xf32, #tpu.memory_space<vmem>>, %arg6: memref<128x128xbf16, #tpu.memory_space<vmem>>, %arg7: memref<128x128xf32, #tpu.memory_space<vmem>>) attributes {dimension_semantics = [#tpu.dimension_semantics<parallel>, #tpu.dimension_semantics<arbitrary>], iteration_bounds = array<i64: 1, 1>, scalar_prefetch = 0 : i64, scratch_operands = 1 : i64, tpu.core_type = #tpu.core_type<tc>, window_params = [{transform_indices = @transform_0, window_bounds = array<i64: 128, 128>}, {pipeline_mode = #tpu.pipeline_mode<synchronous>, transform_indices = @transform_1, window_bounds = array<i64: 128, 128>}, {pipeline_mode = #tpu.pipeline_mode<synchronous>, transform_indices = @transform_2, window_bounds = array<i64: 1, 128>}, {pipeline_mode = #tpu.pipeline_mode<synchronous>, transform_indices = @transform_3, window_bounds = array<i64: 1, 128>}, {transform_indices = @transform_4, window_bounds = array<i64: 128, 128>}]} {
    %c0_i32 = arith.constant 0 : i32
    %0 = arith.cmpi eq, %arg1, %c0_i32 : i32
    %1 = arith.extui %0 : i1 to i32
    %c0_i32_0 = arith.constant 0 : i32
    %2 = arith.cmpi ne, %1, %c0_i32_0 : i32
    scf.if %2 {
      %cst_9 = arith.constant 0.000000e+00 : f32
      %15 = vector.broadcast %cst_9 : f32 to vector<128x128xf32>
      %c0_10 = arith.constant 0 : index
      %c0_11 = arith.constant 0 : index
      %16 = vector.load %arg7[%c0_10, %c0_11] : memref<128x128xf32, #tpu.memory_space<vmem>>, vector<128x128xf32>
      tpu.vector_store %arg7[%c0_10, %c0_11], %15 {strides = array<i32>} : memref<128x128xf32, #tpu.memory_space<vmem>>, vector<128x128xf32>,
    } else {
    }
    %c128_i32 = arith.constant 128 : i32
    %3 = arith.muli %arg1, %c128_i32 : i32
    %4 = tpu.assume_multiple %3, 128 : i32
    %5 = arith.index_cast %4 : i32 to index
    %c0 = arith.constant 0 : index
    %6 = vector.load %arg3[%5, %c0] : memref<128x128xbf16, #tpu.memory_space<vmem>>, vector<128x128xbf16>
    %c0_1 = arith.constant 0 : index
    %c0_2 = arith.constant 0 : index
    %7 = vector.load %arg7[%c0_1, %c0_2] : memref<128x128xf32, #tpu.memory_space<vmem>>, vector<128x128xf32>
    %c0_3 = arith.constant 0 : index
    %c0_4 = arith.constant 0 : index
    %8 = vector.load %arg2[%c0_3, %c0_4] : memref<128x128xbf16, #tpu.memory_space<vmem>>, vector<128x128xbf16>
    %cst = arith.constant dense<0.000000e+00> : vector<128x128xf32>
    %9 = tpu.matmul %8, %6, %cst {dimension_numbers = #tpu.dot_dimension_numbers<[1], [0], [0], [1], [0, 0, 1, 1], [], []>} : vector<128x128xbf16>, vector<128x128xbf16>, vector<128x128xf32> -> vector<128x128xf32>
    %10 = arith.addf %7, %9 : vector<128x128xf32>
    %c0_5 = arith.constant 0 : index
    %c0_6 = arith.constant 0 : index
    %11 = vector.load %arg7[%c0_5, %c0_6] : memref<128x128xf32, #tpu.memory_space<vmem>>, vector<128x128xf32>
    tpu.vector_store %arg7[%c0_5, %c0_6], %10 {strides = array<i32>} : memref<128x128xf32, #tpu.memory_space<vmem>>, vector<128x128xf32>,
    %c0_i32_7 = arith.constant 0 : i32
    %12 = arith.cmpi eq, %arg1, %c0_i32_7 : i32
    %13 = arith.extui %12 : i1 to i32
    %c0_i32_8 = arith.constant 0 : i32
    %14 = arith.cmpi ne, %13, %c0_i32_8 : i32
    scf.if %14 {
      %c0_9 = arith.constant 0 : index
      %c0_10 = arith.constant 0 : index
      %15 = vector.load %arg7[%c0_9, %c0_10] : memref<128x128xf32, #tpu.memory_space<vmem>>, vector<128x128xf32>
      %c0_11 = arith.constant 0 : index
      %c0_12 = arith.constant 0 : index
      %16 = vector.load %arg4[%c0_11, %c0_12] : memref<1x128xf32, #tpu.memory_space<vmem>>, vector<1x128xf32>
      %17 = vector.broadcast %16 : vector<1x128xf32> to vector<128x128xf32>
      %18 = arith.mulf %15, %17 : vector<128x128xf32>
      %c0_13 = arith.constant 0 : index
      %c0_14 = arith.constant 0 : index
      %19 = vector.load %arg5[%c0_13, %c0_14] : memref<1x128xf32, #tpu.memory_space<vmem>>, vector<1x128xf32>
      %20 = vector.broadcast %19 : vector<1x128xf32> to vector<128x128xf32>
      %21 = arith.addf %18, %20 : vector<128x128xf32>
      %cst_15 = arith.constant 0.000000e+00 : f32
      %22 = vector.broadcast %cst_15 : f32 to vector<128x128xf32>
      %23 = arith.maximumf %21, %22 : vector<128x128xf32>
      %24 = arith.truncf %23 : vector<128x128xf32> to vector<128x128xbf16>
      %c0_16 = arith.constant 0 : index
      %c0_17 = arith.constant 0 : index
      %25 = vector.load %arg6[%c0_16, %c0_17] : memref<128x128xbf16, #tpu.memory_space<vmem>>, vector<128x128xbf16>
      tpu.vector_store %arg6[%c0_16, %c0_17], %24 {strides = array<i32>} : memref<128x128xbf16, #tpu.memory_space<vmem>>, vector<128x128xbf16>,
    } else {
    }
    return
  }
  func.func @transform_0(%arg0: i32, %arg1: i32) -> (i32, i32) {
    %c0_i32 = arith.constant 0 : i32
    return %arg0, %arg1 : i32, i32
  }
  func.func @transform_1(%arg0: i32, %arg1: i32) -> (i32, i32) {
    %c0_i32 = arith.constant 0 : i32
    %c0_i32_0 = arith.constant 0 : i32
    %c0_i32_1 = arith.constant 0 : i32
    return %c0_i32, %c0_i32_0 : i32, i32
  }
  func.func @transform_2(%arg0: i32, %arg1: i32) -> (i32, i32) {
    %c0_i32 = arith.constant 0 : i32
    %c0_i32_0 = arith.constant 0 : i32
    %c0_i32_1 = arith.constant 0 : i32
    return %c0_i32, %c0_i32_0 : i32, i32
  }
  func.func @transform_3(%arg0: i32, %arg1: i32) -> (i32, i32) {
    %c0_i32 = arith.constant 0 : i32
    %c0_i32_0 = arith.constant 0 : i32
    %c0_i32_1 = arith.constant 0 : i32
    return %c0_i32, %c0_i32_0 : i32, i32
  }
  func.func @transform_4(%arg0: i32, %arg1: i32) -> (i32, i32) {
    %c0_i32 = arith.constant 0 : i32
    %c0_i32_0 = arith.constant 0 : i32
    return %arg0, %c0_i32 : i32, i32
  }
}

</mosaic_0001>

<bundles_post_ra>
// kernel: tpu_custom_call.1
= control target key start
LH: loop header
LB: loop body
LE: loop exit
PB: predicated region body
PF: predicated region fallthrough
CT: control target
= control target key end

     0   :  { %9 = vsyncpa [#allocation4], 0  ;;  %s755_s0 = inlined_call_operand.hbm [shape: bf16[128,128], index: 0, kind: input, shape index: {}]   ;;  %s756_s1 = inlined_call_operand.hbm [shape: bf16[128,128], index: 1, kind: input, shape index: {}]   ;;  %s757_s2 = inlined_call_operand.vmem [shape: f32[1,128], index: 2, kind: input, shape index: {}]   ;;  %s758_s3 = inlined_call_operand.vmem [shape: f32[1,128], index: 3, kind: input, shape index: {}]   ;;  %s759_s4 = inlined_call_operand.hbm [shape: bf16[128,128], index: 4, kind: output, shape index: {}]  }
   0x1   :  { %10 = vsyncpa [#allocation7], 0 }
   0x2   :  { %11 = vsyncpa [#allocation5], 0  ;;  %s16_s17 = sshll.u32 %s755_s0, 4  ;;  %s665_s18 = smov [#allocation3]   ;;  %s17_s17 = int_to_ptr.hbm [resolvable:$true] %s16_s17 }
   0x3   :  { %s18_s19 = sshll.u32 %s665_s18, 4  ;;  %s29_s22 = sshll.u32 %s756_s1, 4  ;;  %s19_s19 = int_to_ptr.vmem [resolvable:$true] %s18_s19  ;;  %s30_s22 = int_to_ptr.hbm [resolvable:$true] %s29_s22 }
   0x4   :  { %s666_s23 = smov 64   ;;  %s667_s24 = smov 4  }
   0x5   :  { %24 = dma.hbm_to_vmem [thread:$0]  %s17_s17, 1024, %s19_s19, [#allocation4], %s666_s23, %s666_s23, %s667_s24  }
   0x6   :  { %s668_s25 = smov [#allocation6]  }
   0x7   :  { %s31_s26 = sshll.u32 %s668_s25, 4  ;;  %s32_s26 = int_to_ptr.vmem [resolvable:$true] %s31_s26 }
   0x8   :  { %37 = dma.hbm_to_vmem [thread:$0]  %s30_s22, 1024, %s32_s26, [#allocation7], %s666_s23, %s666_s23, %s667_s24  }
   0x9   :  { %659 = dma.done.wait [#allocation4], 1024  }
   0xa   :  { %660 = vsyncadd [#allocation4], 4294966272 }
   0xb   :  { %661 = dma.done.wait [#allocation7], 1024  }
   0xc   :  { %662 = vsyncadd [#allocation7], 4294966272  ;;  %v500_v0 = vld [vmem:[#allocation6 + $0x38] sm:$0xff]  ;;  %v499_v1 = vld [vmem:[#allocation6 + $0x30] sm:$0xff]  ;;  %s413_s5 = sshll.u32 %s759_s4, 4  ;;  %s414_s5 = int_to_ptr.hbm [resolvable:$true] %s413_s5 }
   0xd   :  { %219 = vmatpush.bf16.msra.mxu0 %v500_v0  ;;  %556 = vmatpush.bf16.msra.mxu1 %v500_v0  ;;  %v498_v2 = vld [vmem:[#allocation6 + $0x28] sm:$0xff]  ;;  %v497_v3 = vld [vmem:[#allocation6 + $0x20] sm:$0xff]  ;;  %v496_v4 = vld [vmem:[#allocation6 + $0x18] sm:$0xff] }
   0xe   :  { %557 = vmatpush.bf16.msra.mxu2 %v500_v0  ;;  %558 = vmatpush.bf16.msra.mxu3 %v500_v0  ;;  %v495_v5 = vld [vmem:[#allocation6 + $0x10] sm:$0xff]  ;;  %v494_v6 = vld [vmem:[#allocation6 + $0x8] sm:$0xff]  ;;  %v493_v7 = vld [vmem:[#allocation6] sm:$0xff] }
   0xf   :  { %v501_v8 = vld [vmem:[#allocation3] sm:$0xff]  ;;  %v503_v9 = vld [vmem:[#allocation3 + $0x10] sm:$0xff]  ;;  %v502_v12 = vld [vmem:[#allocation3 + $0x8] sm:$0xff] }
  0x10   :  { %v505_v10 = vld [vmem:[#allocation3 + $0x20] sm:$0xff]  ;;  %v507_v11 = vld [vmem:[#allocation3 + $0x30] sm:$0xff]  ;;  %v504_v13 = vld [vmem:[#allocation3 + $0x18] sm:$0xff] }
  0x11   :  { %220 = vmatpush.bf16.msra.mxu0 %v499_v1  ;;  %559 = vmatpush.bf16.msra.mxu1 %v499_v1  ;;  %v506_v14 = vld [vmem:[#allocation3 + $0x28] sm:$0xff]  ;;  %v508_v15 = vld [vmem:[#allocation3 + $0x38] sm:$0xff]  ;;  %v710_v18 = vld [vmem:[%s757_s2] ss:$0 sm:$0xff]  ;;  %s669_s2 = smov [#allocation8]  }
  0x12   :  { %560 = vmatpush.bf16.msra.mxu2 %v499_v1  ;;  %561 = vmatpush.bf16.msra.mxu3 %v499_v1  ;;  %v716_v20 = vld [vmem:[%s758_s3] ss:$0 sm:$0xff]  ;;  %s411_s3 = sshll.u32 %s669_s2, 4  ;;  %s412_s3 = int_to_ptr.vmem [resolvable:$true] %s411_s3 }
  0x15   :  { %221 = vmatpush.bf16.msra.mxu0 %v498_v2  ;;  %562 = vmatpush.bf16.msra.mxu1 %v498_v2 }
  0x16   :  { %563 = vmatpush.bf16.msra.mxu2 %v498_v2  ;;  %564 = vmatpush.bf16.msra.mxu3 %v498_v2 }
  0x19   :  { %222 = vmatpush.bf16.msra.mxu0 %v497_v3  ;;  %565 = vmatpush.bf16.msra.mxu1 %v497_v3 }
  0x1a   :  { %566 = vmatpush.bf16.msra.mxu2 %v497_v3  ;;  %567 = vmatpush.bf16.msra.mxu3 %v497_v3 }
  0x1d   :  { %223 = vmatpush.bf16.msra.mxu0 %v496_v4  ;;  %568 = vmatpush.bf16.msra.mxu1 %v496_v4 }
  0x1e   :  { %569 = vmatpush.bf16.msra.mxu2 %v496_v4  ;;  %570 = vmatpush.bf16.msra.mxu3 %v496_v4 }
  0x21   :  { %224 = vmatpush.bf16.msra.mxu0 %v495_v5  ;;  %571 = vmatpush.bf16.msra.mxu1 %v495_v5 }
  0x22   :  { %572 = vmatpush.bf16.msra.mxu2 %v495_v5  ;;  %573 = vmatpush.bf16.msra.mxu3 %v495_v5 }
  0x25   :  { %225 = vmatpush.bf16.msra.mxu0 %v494_v6  ;;  %574 = vmatpush.bf16.msra.mxu1 %v494_v6 }
  0x26   :  { %575 = vmatpush.bf16.msra.mxu2 %v494_v6  ;;  %576 = vmatpush.bf16.msra.mxu3 %v494_v6 }
  0x29   :  { %226 = vmatpush.bf16.msra.mxu0 %v493_v7  ;;  %577 = vmatpush.bf16.msra.mxu1 %v493_v7 }
  0x2a   :  { %578 = vmatpush.bf16.msra.mxu2 %v493_v7  ;;  %579 = vmatpush.bf16.msra.mxu3 %v493_v7 }
  0x2c   :  { %227 = vmatmul.bf16.vlgmr.msra.gmra.mxu0 %v501_v8  ;;  %237 = vmatmul.bf16.vlgmr.msra.gmra.mxu1 %v503_v9 }
  0x2d   :  { %247 = vmatmul.bf16.vlgmr.msra.gmra.mxu2 %v505_v10  ;;  %257 = vmatmul.bf16.vlgmr.msra.gmra.mxu3 %v507_v11 }
  0x3c   :  { %232 = vmatmul.bf16.gmra.mxu0 %v502_v12  ;;  %242 = vmatmul.bf16.gmra.mxu1 %v504_v13 }
  0x3d   :  { %252 = vmatmul.bf16.gmra.mxu2 %v506_v14  ;;  %262 = vmatmul.bf16.gmra.mxu3 %v508_v15 }
  0xa9   :  { %v228_v16 = vpop.f32.mrf.mxu0  ;;  %v238_v17 = vpop.f32.mrf.mxu1 }
  0xaa   :  { %v323_v19 = vmul.f32 %v710_v18, %v228_v16  ;;  %v327_v21 = vmul.f32 %v710_v18, %v238_v17 }
  0xac   :  { %v343_v26 = vadd.f32 %v716_v20, %v323_v19  ;;  %v347_v27 = vadd.f32 %v716_v20, %v327_v21 }
  0xae   :  { %v359_v34 = vmax.f32 %v343_v26, 0.0  ;;  %v363_v35 = vmax.f32 %v347_v27, 0.0 }
  0xb0   :  { %v248_v22 = vpop.f32.mrf.mxu2  ;;  %v258_v23 = vpop.f32.mrf.mxu3 }
  0xb1   :  { %v230_v24 = vpop.f32.mrf.mxu0  ;;  %v240_v25 = vpop.f32.mrf.mxu1  ;;  %v331_v32 = vmul.f32 %v710_v18, %v248_v22  ;;  %v335_v33 = vmul.f32 %v710_v18, %v258_v23 }
  0xb2   :  { %v324_v28 = vmul.f32 %v710_v18, %v230_v24  ;;  %v328_v29 = vmul.f32 %v710_v18, %v240_v25 }
  0xb3   :  { %v351_v42 = vadd.f32 %v716_v20, %v331_v32  ;;  %v355_v43 = vadd.f32 %v716_v20, %v335_v33 }
  0xb4   :  { %v344_v30 = vadd.f32 %v716_v20, %v324_v28  ;;  %v348_v31 = vadd.f32 %v716_v20, %v328_v29 }
  0xb5   :  { %v367_v50 = vmax.f32 %v351_v42, 0.0  ;;  %v371_v51 = vmax.f32 %v355_v43, 0.0 }
  0xb6   :  { %v360_v36 = vmax.f32 %v344_v30, 0.0  ;;  %v364_v37 = vmax.f32 %v348_v31, 0.0 }
  0xb8   :  { %v512_v38 = vpack.c.bf16 %v360_v36, %v359_v34  ;;  %v522_v39 = vpack.c.bf16 %v364_v37, %v363_v35  ;;  %v250_v40 = vpop.f32.mrf.mxu2  ;;  %v260_v41 = vpop.f32.mrf.mxu3 }
  0xb9   :  { %v332_v44 = vmul.f32 %v710_v18, %v250_v40  ;;  %v336_v45 = vmul.f32 %v710_v18, %v260_v41  ;;  %v233_v46 = vpop.f32.mrf.mxu0  ;;  %v243_v47 = vpop.f32.mrf.mxu1 }
  0xba   :  { %513 = vst [vmem:[#allocation8] sm:$0xff] %v512_v38   ;;  %v325_v54 = vmul.f32 %v710_v18, %v233_v46  ;;  %v329_v55 = vmul.f32 %v710_v18, %v243_v47 }
  0xbb   :  { %550 = vst [vmem:[#allocation8 + $0x10] sm:$0xff] %v522_v39   ;;  %v352_v48 = vadd.f32 %v716_v20, %v332_v44  ;;  %v356_v49 = vadd.f32 %v716_v20, %v336_v45 }
  0xbc   :  { %v345_v62 = vadd.f32 %v716_v20, %v325_v54  ;;  %v349_v63 = vadd.f32 %v716_v20, %v329_v55 }
  0xbd   :  { %v368_v52 = vmax.f32 %v352_v48, 0.0  ;;  %v372_v53 = vmax.f32 %v356_v49, 0.0 }
  0xbe   :  { %v361_v6 = vmax.f32 %v345_v62, 0.0  ;;  %v365_v7 = vmax.f32 %v349_v63, 0.0 }
  0xbf   :  { %v532_v56 = vpack.c.bf16 %v368_v52, %v367_v50  ;;  %v542_v57 = vpack.c.bf16 %v372_v53, %v371_v51 }
  0xc0   :  { %v253_v58 = vpop.f32.mrf.mxu2  ;;  %v263_v59 = vpop.f32.mrf.mxu3 }
  0xc1   :  { %552 = vst [vmem:[#allocation8 + $0x20] sm:$0xff] %v532_v56   ;;  %v235_v60 = vpop.f32.mrf.mxu0  ;;  %v245_v61 = vpop.f32.mrf.mxu1  ;;  %v333_v4 = vmul.f32 %v710_v18, %v253_v58  ;;  %v337_v5 = vmul.f32 %v710_v18, %v263_v59 }
  0xc2   :  { %554 = vst [vmem:[#allocation8 + $0x30] sm:$0xff] %v542_v57   ;;  %v326_v0 = vmul.f32 %v710_v18, %v235_v60  ;;  %v330_v1 = vmul.f32 %v710_v18, %v245_v61 }
  0xc3   :  { %v353_v14 = vadd.f32 %v716_v20, %v333_v4  ;;  %v357_v15 = vadd.f32 %v716_v20, %v337_v5 }
  0xc4   :  { %v346_v2 = vadd.f32 %v716_v20, %v326_v0  ;;  %v350_v3 = vadd.f32 %v716_v20, %v330_v1 }
  0xc5   :  { %v369_v22 = vmax.f32 %v353_v14, 0.0  ;;  %v373_v23 = vmax.f32 %v357_v15, 0.0 }
  0xc6   :  { %v362_v8 = vmax.f32 %v346_v2, 0.0  ;;  %v366_v9 = vmax.f32 %v350_v3, 0.0 }
  0xc8   :  { %v517_v10 = vpack.c.bf16 %v362_v8, %v361_v6  ;;  %v527_v11 = vpack.c.bf16 %v366_v9, %v365_v7  ;;  %v255_v12 = vpop.f32.mrf.mxu2  ;;  %v265_v13 = vpop.f32.mrf.mxu3 }
  0xc9   :  { %v334_v16 = vmul.f32 %v710_v18, %v255_v12  ;;  %v338_v17 = vmul.f32 %v710_v18, %v265_v13 }
  0xca   :  { %549 = vst [vmem:[#allocation8 + $0x8] sm:$0xff] %v517_v10  }
  0xcb   :  { %551 = vst [vmem:[#allocation8 + $0x18] sm:$0xff] %v527_v11   ;;  %v354_v19 = vadd.f32 %v716_v20, %v334_v16  ;;  %v358_v21 = vadd.f32 %v716_v20, %v338_v17 }
  0xcd   :  { %v370_v24 = vmax.f32 %v354_v19, 0.0  ;;  %v374_v25 = vmax.f32 %v358_v21, 0.0 }
  0xcf   :  { %v537_v26 = vpack.c.bf16 %v370_v24, %v369_v22  ;;  %v547_v27 = vpack.c.bf16 %v374_v25, %v373_v23 }
  0xd1   :  { %553 = vst [vmem:[#allocation8 + $0x28] sm:$0xff] %v537_v26  }
  0xd2   :  { %555 = vst [vmem:[#allocation8 + $0x38] sm:$0xff] %v547_v27  }
  0xd3   :  { %419 = dma.vmem_to_hbm [thread:$0]  %s412_s3, 1024, %s414_s5, [#allocation5], %s666_s23, %s666_s23, %s667_s24  }
  0xd4   :  { %663 = dma.done.wait [#allocation5], 1024  }
  0xd5   :  { %664 = vsyncadd [#allocation5], 4294966272 }
  0xd6   :  { %424 = vsyncpa [#allocation4], 1 }
  0xd7   :  { %425 = vsyncpa [#allocation7], 1 }
  0xd8   :  { %426 = vsyncpa [#allocation5], 1 }

</bundles_post_ra>
